<compile_context>
chip_gen: v7x
topology: tpu7x:2x2x1
jax: 0.10.0
libtpu: 0.0.40
codegen_flags: <defaults>
</compile_context>

<pallas_src>
import functools

import jax
import jax.numpy as jnp
from jax.experimental import pallas as pl
from jax.experimental.pallas import tpu as pltpu

EPS = 1e-5  # PyTorch nn.LayerNorm default


def _vmem_limit_bytes():
    """Scoped-VMEM limit: ~3/4 of physical VMEM, capped; conservative fallback."""
    try:
        cap = pltpu.get_tpu_info().vmem_capacity_bytes
    except Exception:
        cap = 64 * 1024 * 1024  # v7x per-TensorCore VMEM (smallest of v5e/v6e/v7x)
    return int(min(cap * 3 // 4, 96 * 1024 * 1024))


def _pick_row_tile(rows, hidden_p, itemsize, tile_budget_bytes):
    """Largest row tile (multiple of sublane packing) that fits the VMEM budget."""
    sublane = {4: 8, 2: 16, 1: 32}.get(itemsize, 8)
    # Per-row working set: (x, y, out) double-buffered in the I/O dtype
    # plus ~4 f32-sized temporaries inside the kernel body.
    per_row = hidden_p * (3 * 2 * itemsize + 4 * 4)
    tile = max(sublane, min(tile_budget_bytes // per_row, 1024))
    tile = (tile // sublane) * sublane
    # Don't make the tile (much) larger than the problem.
    rows_rounded = int(pl.cdiv(rows, sublane)) * sublane
    return int(min(tile, rows_rounded))


def addnorm_kernel(x_ref, y_ref, gamma_ref, beta_ref, o_ref, *, hidden, eps):
    # Residual add (dropout == identity in eval mode), accumulate in f32.
    z = x_ref[...].astype(jnp.float32) + y_ref[...].astype(jnp.float32)

    # One-pass LayerNorm statistics over the (possibly zero-padded) hidden axis.
    # Zero padding contributes nothing to the sums; divide by the true hidden.
    inv_h = jnp.float32(1.0 / hidden)
    s = jnp.sum(z, axis=-1, keepdims=True)
    sq = jnp.sum(z * z, axis=-1, keepdims=True)
    mean = s * inv_h
    var = jnp.maximum(sq * inv_h - mean * mean, 0.0)
    inv_std = jax.lax.rsqrt(var + eps)

    gamma = gamma_ref[...].astype(jnp.float32)  # (1, Hp) -> broadcasts over rows
    beta = beta_ref[...].astype(jnp.float32)
    o_ref[...] = ((z - mean) * inv_std * gamma + beta).astype(o_ref.dtype)


def add_norm(x, y, gamma, beta, *, row_tile=None, eps=EPS):
    """x, y: [rows, hidden]; gamma, beta: [hidden]."""
    rows, hidden = x.shape

    # Lane-dense tiles: pad hidden up to a multiple of 128 with zeros (does not
    # change the LayerNorm statistics; the kernel divides by the true hidden).
    hidden_p = int(pl.cdiv(hidden, 128)) * 128
    pad = hidden_p - hidden
    if pad:
        x = jnp.pad(x, ((0, 0), (0, pad)))
        y = jnp.pad(y, ((0, 0), (0, pad)))
        gamma = jnp.pad(gamma, (0, pad))
        beta = jnp.pad(beta, (0, pad))
    gamma2d = gamma.reshape(1, hidden_p)
    beta2d = beta.reshape(1, hidden_p)

    vmem_limit = _vmem_limit_bytes()
    if row_tile is None:
        row_tile = _pick_row_tile(rows, hidden_p, x.dtype.itemsize,
                                  tile_budget_bytes=(vmem_limit * 2) // 3)

    grid = (int(pl.cdiv(rows, row_tile)),)  # ragged last tile: OOB rows masked

    kernel = functools.partial(addnorm_kernel, hidden=hidden, eps=eps)
    out = pl.pallas_call(
        kernel,
        out_shape=jax.ShapeDtypeStruct((rows, hidden_p), x.dtype),
        grid_spec=pltpu.PrefetchScalarGridSpec(
            num_scalar_prefetch=0,
            grid=grid,
            in_specs=[
                pl.BlockSpec((row_tile, hidden_p), lambda i: (i, 0)),
                pl.BlockSpec((row_tile, hidden_p), lambda i: (i, 0)),
                pl.BlockSpec((1, hidden_p), lambda i: (0, 0)),
                pl.BlockSpec((1, hidden_p), lambda i: (0, 0)),
            ],
            out_specs=pl.BlockSpec((row_tile, hidden_p), lambda i: (i, 0)),
        ),
        compiler_params=pltpu.CompilerParams(
            dimension_semantics=("parallel",),
            vmem_limit_bytes=vmem_limit,
        ),
    )(x, y, gamma2d, beta2d)

    return out[:, :hidden] if pad else out


def add_norm_bsh(X, Y, gamma, beta, *, row_tile=None):
    """X, Y: [batch, seq, hidden] -> [batch, seq, hidden]."""
    B, S, H = X.shape
    out = add_norm(X.reshape(B * S, H), Y.reshape(B * S, H), gamma, beta,
                   row_tile=row_tile)
    return out.reshape(B, S, H)


def _reference(X, Y, gamma, beta, eps=EPS):
    z = X + Y
    mean = jnp.mean(z, axis=-1, keepdims=True)
    var = jnp.mean((z - mean) ** 2, axis=-1, keepdims=True)
    return (z - mean) / jnp.sqrt(var + eps) * gamma + beta


if __name__ == "__main__":
    key = jax.random.PRNGKey(0)
    kx, ky = jax.random.split(key)

    batch, seq, hidden = 2, 8, 32  # normalized_shape = hidden = 32
    X = jax.random.normal(kx, (batch, seq, hidden), dtype=jnp.float32)
    Y = jax.random.normal(ky, (batch, seq, hidden), dtype=jnp.float32)

    # nn.LayerNorm deterministic init: weight = 1, bias = 0
    gamma = jnp.ones((hidden,), dtype=jnp.float32)
    beta = jnp.zeros((hidden,), dtype=jnp.float32)

    out = jax.block_until_ready(add_norm_bsh(X, Y, gamma, beta))
    ref = _reference(X, Y, gamma, beta)
    assert out.shape == (batch, seq, hidden)
    assert jnp.allclose(out, ref, atol=1e-4, rtol=1e-4), "mismatch vs reference"

    # Ragged row count exercises the cdiv grid + masked last tile path.
    rows2 = 20
    X2 = jax.random.normal(kx, (rows2, hidden), dtype=jnp.float32)
    Y2 = jax.random.normal(ky, (rows2, hidden), dtype=jnp.float32)
    out2 = jax.block_until_ready(add_norm(X2, Y2, gamma, beta))
    ref2 = _reference(X2, Y2, gamma, beta)
    assert jnp.allclose(out2, ref2, atol=1e-4, rtol=1e-4), "ragged mismatch"

    print("KERNEL_OK")
</pallas_src>

<mosaic_0001>
module attributes {stable_mosaic.version = 11 : i64} {
  func.func @addnorm_kernel(%arg0: i32, %arg1: memref<16x128xf32, #tpu.memory_space<vmem>>, %arg2: memref<16x128xf32, #tpu.memory_space<vmem>>, %arg3: memref<1x128xf32, #tpu.memory_space<vmem>>, %arg4: memref<1x128xf32, #tpu.memory_space<vmem>>, %arg5: memref<16x128xf32, #tpu.memory_space<vmem>>) attributes {dimension_semantics = [#tpu.dimension_semantics<parallel>], iteration_bounds = array<i64: 1>, scalar_prefetch = 0 : i64, scratch_operands = 0 : i64, tpu.core_type = #tpu.core_type<tc>, window_params = [{transform_indices = @transform_0, window_bounds = array<i64: 16, 128>}, {transform_indices = @transform_1, window_bounds = array<i64: 16, 128>}, {pipeline_mode = #tpu.pipeline_mode<synchronous>, transform_indices = @transform_2, window_bounds = array<i64: 1, 128>}, {pipeline_mode = #tpu.pipeline_mode<synchronous>, transform_indices = @transform_3, window_bounds = array<i64: 1, 128>}, {transform_indices = @transform_4, window_bounds = array<i64: 16, 128>}]} {
    %c0 = arith.constant 0 : index
    %c0_0 = arith.constant 0 : index
    %0 = vector.load %arg1[%c0, %c0_0] : memref<16x128xf32, #tpu.memory_space<vmem>>, vector<16x128xf32>
    %c0_1 = arith.constant 0 : index
    %c0_2 = arith.constant 0 : index
    %1 = vector.load %arg2[%c0_1, %c0_2] : memref<16x128xf32, #tpu.memory_space<vmem>>, vector<16x128xf32>
    %2 = arith.addf %0, %1 : vector<16x128xf32>
    %cst = arith.constant dense<0.000000e+00> : vector<16xf32>
    %3 = vector.multi_reduction <add>, %2, %cst [1] : vector<16x128xf32> to vector<16xf32>
    %4 = vector.shape_cast %3 : vector<16xf32> to vector<16x1xf32>
    %5 = arith.mulf %2, %2 : vector<16x128xf32>
    %cst_3 = arith.constant dense<0.000000e+00> : vector<16xf32>
    %6 = vector.multi_reduction <add>, %5, %cst_3 [1] : vector<16x128xf32> to vector<16xf32>
    %7 = vector.shape_cast %6 : vector<16xf32> to vector<16x1xf32>
    %cst_4 = arith.constant 3.125000e-02 : f32
    %8 = vector.broadcast %cst_4 : f32 to vector<16x1xf32>
    %9 = arith.mulf %4, %8 : vector<16x1xf32>
    %cst_5 = arith.constant 3.125000e-02 : f32
    %10 = vector.broadcast %cst_5 : f32 to vector<16x1xf32>
    %11 = arith.mulf %7, %10 : vector<16x1xf32>
    %12 = arith.mulf %9, %9 : vector<16x1xf32>
    %13 = arith.subf %11, %12 : vector<16x1xf32>
    %cst_6 = arith.constant 0.000000e+00 : f32
    %14 = vector.broadcast %cst_6 : f32 to vector<16x1xf32>
    %15 = arith.maximumf %13, %14 : vector<16x1xf32>
    %cst_7 = arith.constant 9.99999974E-6 : f32
    %16 = vector.broadcast %cst_7 : f32 to vector<16x1xf32>
    %17 = arith.addf %15, %16 : vector<16x1xf32>
    %18 = math.rsqrt %17 : vector<16x1xf32>
    %c0_8 = arith.constant 0 : index
    %c0_9 = arith.constant 0 : index
    %19 = vector.load %arg3[%c0_8, %c0_9] : memref<1x128xf32, #tpu.memory_space<vmem>>, vector<1x128xf32>
    %c0_10 = arith.constant 0 : index
    %c0_11 = arith.constant 0 : index
    %20 = vector.load %arg4[%c0_10, %c0_11] : memref<1x128xf32, #tpu.memory_space<vmem>>, vector<1x128xf32>
    %21 = vector.broadcast %9 : vector<16x1xf32> to vector<16x128xf32>
    %22 = arith.subf %2, %21 : vector<16x128xf32>
    %23 = vector.broadcast %18 : vector<16x1xf32> to vector<16x128xf32>
    %24 = arith.mulf %22, %23 : vector<16x128xf32>
    %25 = vector.broadcast %19 : vector<1x128xf32> to vector<16x128xf32>
    %26 = arith.mulf %24, %25 : vector<16x128xf32>
    %27 = vector.broadcast %20 : vector<1x128xf32> to vector<16x128xf32>
    %28 = arith.addf %26, %27 : vector<16x128xf32>
    %c0_12 = arith.constant 0 : index
    %c0_13 = arith.constant 0 : index
    %29 = vector.load %arg5[%c0_12, %c0_13] : memref<16x128xf32, #tpu.memory_space<vmem>>, vector<16x128xf32>
    tpu.vector_store %arg5[%c0_12, %c0_13], %28 {strides = array<i32>} : memref<16x128xf32, #tpu.memory_space<vmem>>, vector<16x128xf32>,
    return
  }
  func.func @transform_0(%arg0: i32) -> (i32, i32) {
    %c0_i32 = arith.constant 0 : i32
    %c0_i32_0 = arith.constant 0 : i32
    return %arg0, %c0_i32 : i32, i32
  }
  func.func @transform_1(%arg0: i32) -> (i32, i32) {
    %c0_i32 = arith.constant 0 : i32
    %c0_i32_0 = arith.constant 0 : i32
    return %arg0, %c0_i32 : i32, i32
  }
  func.func @transform_2(%arg0: i32) -> (i32, i32) {
    %c0_i32 = arith.constant 0 : i32
    %c0_i32_0 = arith.constant 0 : i32
    %c0_i32_1 = arith.constant 0 : i32
    return %c0_i32, %c0_i32_0 : i32, i32
  }
  func.func @transform_3(%arg0: i32) -> (i32, i32) {
    %c0_i32 = arith.constant 0 : i32
    %c0_i32_0 = arith.constant 0 : i32
    %c0_i32_1 = arith.constant 0 : i32
    return %c0_i32, %c0_i32_0 : i32, i32
  }
  func.func @transform_4(%arg0: i32) -> (i32, i32) {
    %c0_i32 = arith.constant 0 : i32
    %c0_i32_0 = arith.constant 0 : i32
    return %arg0, %c0_i32 : i32, i32
  }
}

</mosaic_0001>

<bundles_post_ra>
// kernel: tpu_custom_call.1
= control target key start
LH: loop header
LB: loop body
LE: loop exit
PB: predicated region body
PF: predicated region fallthrough
CT: control target
= control target key end

     0   :  { %9 = vsyncpa [#allocation3], 0  ;;  %s282_s0 = inlined_call_operand.hbm [shape: f32[16,128], index: 0, kind: input, shape index: {}]   ;;  %s283_s1 = inlined_call_operand.hbm [shape: f32[16,128], index: 1, kind: input, shape index: {}]   ;;  %s284_s2 = inlined_call_operand.vmem [shape: f32[1,128], index: 2, kind: input, shape index: {}]   ;;  %s285_s3 = inlined_call_operand.vmem [shape: f32[1,128], index: 3, kind: input, shape index: {}]   ;;  %s286_s4 = inlined_call_operand.hbm [shape: f32[16,128], index: 4, kind: output, shape index: {}]  }
   0x1   :  { %10 = vsyncpa [#allocation6], 0 }
   0x2   :  { %11 = vsyncpa [#allocation4], 0  ;;  %s201_s15 = smov [#allocation2]   ;;  %s129_s19 = scalar_lea.hbm %s282_s0, 256 }
   0x3   :  { %s17_s16 = sshll.u32 %s201_s15, 4  ;;  %p130_p0 = scmp.ne.s32.totalorder %s282_s0, %s129_s19  ;;  %s18_s16 = int_to_ptr.vmem [resolvable:$true] %s17_s16 }
   0x4   :  { %p133_p1 = scmp.lt.u32.totalorder %s129_s19, %s282_s0 }
   0x6   :  { %p135_p2 = pnand %p133_p1, %p130_p0 }
   0x8   :  { %138 = shalt.err (!%p135_p2)
}
   0x9   :  { %s139_s24 = scalar_lea.vmem %s18_s16, 256  ;;  %p144_p4 = scmp.lt.s32.totalorder %s18_s16, %s18_s16 }
   0xa   :  { %p140_p3 = scmp.ne.s32.totalorder %s18_s16, %s139_s24  ;;  %p145_p5 = scmp.lt.s32.totalorder %s139_s24, %s139_s24 }
   0xc   :  { %p146_p6 = por %p145_p5, %p144_p4 }
   0xe   :  { %p147_p7 = pnand %p146_p6, %p140_p3 }
  0x10   :  { %150 = shalt.err (!%p147_p7)
}
  0x11   :  { %s202_s25 = smov 128   ;;  %s203_s26 = smov 8  }
  0x12   :  { %23 = dma.hbm_to_vmem [thread:$0]  %s282_s0, 256, %s18_s16, [#allocation3], %s202_s25, %s202_s25, %s203_s26  }
  0x13   :  { %s204_s29 = smov [#allocation5]   ;;  %s151_s7 = scalar_lea.hbm %s283_s1, 256 }
  0x14   :  { %s29_s30 = sshll.u32 %s204_s29, 4  ;;  %p152_p8 = scmp.ne.s32.totalorder %s283_s1, %s151_s7  ;;  %s30_s30 = int_to_ptr.vmem [resolvable:$true] %s29_s30 }
  0x15   :  { %p155_p9 = scmp.lt.u32.totalorder %s151_s7, %s283_s1 }
  0x17   :  { %p157_p10 = pnand %p155_p9, %p152_p8 }
  0x19   :  { %160 = shalt.err (!%p157_p10)
}
  0x1a   :  { %s161_s12 = scalar_lea.vmem %s30_s30, 256  ;;  %p166_p12 = scmp.lt.s32.totalorder %s30_s30, %s30_s30 }
  0x1b   :  { %p162_p11 = scmp.ne.s32.totalorder %s30_s30, %s161_s12  ;;  %p167_p13 = scmp.lt.s32.totalorder %s161_s12, %s161_s12 }
  0x1d   :  { %p168_p0 = por %p167_p13, %p166_p12 }
  0x1f   :  { %p169_p1 = pnand %p168_p0, %p162_p11 }
  0x21   :  { %172 = shalt.err (!%p169_p1)
}
  0x22   :  { %35 = dma.hbm_to_vmem [thread:$0]  %s283_s1, 256, %s30_s30, [#allocation6], %s202_s25, %s202_s25, %s203_s26  }
  0x23   :  { %195 = dma.done.wait [#allocation3], 256  }
  0x24   :  { %196 = vsyncadd [#allocation3], 4294967040 }
  0x25   :  { %197 = dma.done.wait [#allocation6], 256  }
  0x26   :  { %198 = vsyncadd [#allocation6], 4294967040  ;;  %v46_v0 = vld [vmem:[#allocation2] sm:$0xff]  ;;  %v48_v1 = vld [vmem:[#allocation5] sm:$0xff]  ;;  %s205_s17 = smov [#allocation7]  }
  0x27   :  { %v47_v2 = vld [vmem:[#allocation2 + $0x8] sm:$0xff]  ;;  %v50_v3 = vadd.f32 %v48_v1, %v46_v0  ;;  %v49_v4 = vld [vmem:[#allocation5 + $0x8] sm:$0xff]  ;;  %v118_v26 = vld [vmem:[%s284_s2] ss:$0 sm:$0xff]  ;;  %s105_s18 = sshll.u32 %s205_s17, 4  ;;  %s106_s18 = int_to_ptr.vmem [resolvable:$true] %s105_s18 }
  0x28   :  { %v51_v5 = vadd.f32 %v49_v4, %v47_v2  ;;  %v119_v28 = vld [vmem:[%s285_s3] ss:$0 sm:$0xff]  ;;  %s173_s19 = scalar_lea.vmem %s106_s18, 256  ;;  %p178_p3 = scmp.lt.s32.totalorder %s106_s18, %s106_s18 }
  0x29   :  { %52 = vadd.xlane.f32.xlu0 %v50_v3  ;;  %v56_v6 = vmul.f32 %v50_v3, %v50_v3  ;;  %p174_p2 = scmp.ne.s32.totalorder %s106_s18, %s173_s19  ;;  %p179_p4 = scmp.lt.s32.totalorder %s173_s19, %s173_s19 }
  0x2a   :  { %v57_v7 = vmul.f32 %v51_v5, %v51_v5 }
  0x2b   :  { %58 = vadd.xlane.f32.xlu1 %v56_v6  ;;  %p180_p5 = por %p179_p4, %p178_p3 }
  0x2d   :  { %54 = vadd.xlane.f32.xlu0 %v51_v5  ;;  %p181_p6 = pnand %p180_p5, %p174_p2 }
  0x2f   :  { %60 = vadd.xlane.f32.xlu1 %v57_v7 }
  0xb6   :  { %v53_v8 = vpop.xlane.xlu0 %52 }
  0xb7   :  { %v62_v9 = vmul.f32 0.03125, %v53_v8 }
  0xb8   :  { %v59_v10 = vpop.xlane.xlu1 %58 }
  0xb9   :  { %v66_v11 = vmul.f32 %v62_v9, %v62_v9  ;;  %v64_v12 = vmul.f32 0.03125, %v59_v10  ;;  %v78_v24 = vsub.f32 %v50_v3, %v62_v9 }
  0xba   :  { %v55_v13 = vpop.xlane.xlu0 %54 }
  0xbb   :  { %v68_v14 = vsub.f32 %v64_v12, %v66_v11  ;;  %v63_v15 = vmul.f32 0.03125, %v55_v13 }
  0xbc   :  { %v61_v16 = vpop.xlane.xlu1 %60 }
  0xbd   :  { %v70_v17 = vmax.f32 %v68_v14, 0.0  ;;  %v67_v18 = vmul.f32 %v63_v15, %v63_v15  ;;  %v65_v19 = vmul.f32 0.03125, %v61_v16  ;;  %v79_v29 = vsub.f32 %v51_v5, %v63_v15 }
  0xbf   :  { %v72_v20 = vadd.f32 1e-05, %v70_v17  ;;  %v69_v21 = vsub.f32 %v65_v19, %v67_v18 }
  0xc1   :  { %125 = vrsqrt.f32 %v72_v20  ;;  %v71_v22 = vmax.f32 %v69_v21, 0.0 }
  0xc3   :  { %v73_v23 = vadd.f32 1e-05, %v71_v22 }
  0xc5   :  { %127 = vrsqrt.f32 %v73_v23 }
  0xcb   :  { %v126_v25 = vpop.eup %125 }
  0xcc   :  { %v80_v27 = vmul.f32 %v126_v25, %v78_v24 }
  0xce   :  { %v88_v30 = vmul.f32 %v118_v26, %v80_v27 }
  0xcf   :  { %v128_v31 = vpop.eup %127 }
  0xd0   :  { %v81_v32 = vmul.f32 %v128_v31, %v79_v29  ;;  %v96_v33 = vadd.f32 %v119_v28, %v88_v30 }
  0xd2   :  { %v89_v34 = vmul.f32 %v118_v26, %v81_v32  ;;  %98 = vst [vmem:[#allocation7] sm:$0xff] %v96_v33 }
  0xd4   :  { %v97_v35 = vadd.f32 %v119_v28, %v89_v34 }
  0xd6   :  { %99 = vst [vmem:[#allocation7 + $0x8] sm:$0xff] %v97_v35 }
  0xd7   :  { %184 = shalt.err (!%p181_p6)
}
  0xd8   :  { %s185_s20 = scalar_lea.hbm %s286_s4, 256 }
  0xd9   :  { %p186_p7 = scmp.ne.s32.totalorder %s286_s4, %s185_s20  ;;  %p189_p8 = scmp.lt.u32.totalorder %s185_s20, %s286_s4 }
  0xdb   :  { %p191_p9 = pnand %p189_p8, %p186_p7 }
  0xdd   :  { %194 = shalt.err (!%p191_p9)
}
  0xde   :  { %111 = dma.vmem_to_hbm [thread:$0]  %s106_s18, 256, %s286_s4, [#allocation4], %s202_s25, %s202_s25, %s203_s26  }
  0xdf   :  { %199 = dma.done.wait [#allocation4], 256  }
  0xe0   :  { %200 = vsyncadd [#allocation4], 4294967040 }
  0xe1   :  { %115 = vsyncpa [#allocation3], 1 }
  0xe2   :  { %116 = vsyncpa [#allocation6], 1 }
  0xe3   :  { %117 = vsyncpa [#allocation4], 1 }

</bundles_post_ra>
